<compile_context>
chip_gen: v7x
topology: tpu7x:2x2x1
jax: 0.10.0
libtpu: 0.0.40
codegen_flags: <defaults>
</compile_context>

<pallas_src>
import functools

import jax
import jax.numpy as jnp
from jax.experimental import pallas as pl
from jax.experimental.pallas import tpu as pltpu

_DEFAULT_VMEM_BYTES = 128 * 1024 * 1024


def _vmem_capacity_bytes():
    try:
        info = pltpu.get_tpu_info()
        cap = getattr(info, "vmem_capacity_bytes", None)
        if cap:
            return int(cap)
    except Exception:
        pass
    return _DEFAULT_VMEM_BYTES


def _per_buffer_budget_bytes():
    # Target multi-MiB DMAs per grid step (per-step overhead ~0.35us) while
    # leaving room for double-buffering + weights + scratch even on v7x's
    # 64 MiB of physical VMEM (v5e/v6e have 128 MiB).
    return min(8 * 1024 * 1024, _vmem_capacity_bytes() // 6)


def _pick_hw_tile(hw, c, itemsize, per_buf):
    if c * hw * itemsize <= per_buf:
        return hw
    tile = (per_buf // (c * itemsize)) // 128 * 128
    return max(128, int(tile))


def _pick_batch_tile(b, c, hw_tile, itemsize, per_buf):
    if b <= 1:
        return 1
    target = max(1, per_buf // max(1, c * hw_tile * itemsize))
    # Keep at least two entries on the "parallel" batch axis so both v7x
    # TensorCores have work (single-TC v5e/v6e are indifferent).
    target = max(1, min(target, b // 2))
    bt = 1
    for cand in range(1, b + 1):
        if b % cand == 0 and cand <= target:
            bt = cand
    return bt


def _channel_attention_kernel(x_ref, w1t_ref, w2t_ref, o_ref,
                              sum_ref, max_ref, *, hw, hw_tile):
    # x_ref:   (Bt, C, hw_tile)  current spatial tile of Bt batch elements
    # w1t_ref: (C, hid)          f1.weight transposed (in, out)
    # w2t_ref: (hid, C)          f2.weight transposed (in, out)
    # o_ref:   (Bt, 1, C)        lane-dense output rows
    # sum_ref: (Bt, C) f32       running spatial sum
    # max_ref: (Bt, C) f32       running spatial max
    k = pl.program_id(1)
    n_k = pl.num_programs(1)

    @pl.when(k == 0)
    def _init():
        sum_ref[...] = jnp.zeros_like(sum_ref)
        max_ref[...] = jnp.full_like(max_ref, -jnp.inf)

    x = x_ref[...]  # (Bt, C, hw_tile)
    rem = hw % hw_tile

    def _accumulate(x_sum_in, x_max_in):
        # f32 accumulation for the sum; the per-tile max reduce stays in the
        # input dtype (exact), only the (Bt, C) result is cast.
        sum_ref[...] = sum_ref[...] + jnp.sum(
            x_sum_in.astype(jnp.float32), axis=-1)
        max_ref[...] = jnp.maximum(
            max_ref[...], jnp.max(x_max_in, axis=-1).astype(jnp.float32))

    if rem == 0:
        _accumulate(x, x)
    else:
        # Mask only the (single) partial last tile; keep the common path clean.
        @pl.when(k != n_k - 1)
        def _acc_full():
            _accumulate(x, x)

        @pl.when(k == n_k - 1)
        def _acc_masked():
            lane = jax.lax.broadcasted_iota(jnp.int32, x.shape, x.ndim - 1)
            in_bounds = lane < rem
            _accumulate(jnp.where(in_bounds, x, 0.0),
                        jnp.where(in_bounds, x, -jnp.inf))

    @pl.when(k == n_k - 1)
    def _finalize():
        w1t = w1t_ref[...].astype(jnp.float32)   # (C, hid)
        w2t = w2t_ref[...].astype(jnp.float32)   # (hid, C)
        bt, c = sum_ref.shape
        avg = sum_ref[...] * (1.0 / hw)          # (Bt, C)  == AdaptiveAvgPool2d(1)
        mx = max_ref[...]                        # (Bt, C)  == AdaptiveMaxPool2d(1)

        # Shared MLP: f2(relu(f1(avg))) + f2(relu(f1(max))).
        # f2 is linear, so it is applied once to the sum of the ReLU'd hiddens.
        h = (jnp.maximum(jnp.dot(avg, w1t, preferred_element_type=jnp.float32), 0.0)
             + jnp.maximum(jnp.dot(mx, w1t, preferred_element_type=jnp.float32), 0.0))
        row = jnp.dot(h, w2t, preferred_element_type=jnp.float32)   # (Bt, C)
        o_ref[...] = jax.nn.sigmoid(row).reshape(bt, 1, c).astype(o_ref.dtype)


def channel_attention(x, w1, w2, *, hw_tile=None, batch_tile=None):
    """x: (B, C, H, W); w1: (C//r, C) = f1.weight; w2: (C, C//r) = f2.weight.

    Returns sigmoid(f2(relu(f1(avg_pool(x)))) + f2(relu(f1(max_pool(x))))) with
    shape (B, C, 1, 1), matching the PyTorch module.
    """
    B, C, H, W = x.shape
    hid = w1.shape[0]
    assert w1.shape == (hid, C) and w2.shape == (C, hid)
    hw = H * W
    itemsize = jnp.dtype(x.dtype).itemsize
    per_buf = _per_buffer_budget_bytes()

    if hw_tile is None:
        hw_tile = _pick_hw_tile(hw, C, itemsize, per_buf)
    hw_tile = min(int(hw_tile), hw)
    if hw_tile != hw and hw_tile % 128 != 0:
        raise ValueError("hw_tile must be a multiple of 128 or the full H*W")
    n_tiles = pl.cdiv(hw, hw_tile)

    if batch_tile is None:
        bt = _pick_batch_tile(B, C, hw_tile, itemsize, per_buf)
    else:
        bt = max(1, min(int(batch_tile), B))
        while B % bt:
            bt -= 1

    x_flat = x.reshape(B, C, hw)
    w1t = w1.T   # (C, hid), transposed once outside the kernel
    w2t = w2.T   # (hid, C)

    # Explicit scoped-VMEM budget: double-buffered x blocks + weights + output
    # + scratch + margin, clipped against physical VMEM (64 MiB on v7x).
    w_itemsize = jnp.dtype(w1.dtype).itemsize
    x_block_bytes = bt * C * hw_tile * itemsize
    w_bytes = 2 * hid * C * w_itemsize
    out_bytes = bt * max(C, 128) * itemsize
    scratch_bytes = 2 * max(bt, 8) * max(C, 128) * 4
    needed = 3 * x_block_bytes + 2 * w_bytes + 2 * out_bytes + scratch_bytes \
        + 4 * 1024 * 1024
    vmem_limit = int(min(max(needed, 32 * 1024 * 1024),
                         _vmem_capacity_bytes() * 3 // 4))

    kernel = functools.partial(_channel_attention_kernel, hw=hw, hw_tile=hw_tile)

    out = pl.pallas_call(
        kernel,
        out_shape=jax.ShapeDtypeStruct((B, 1, C), x.dtype),
        grid_spec=pltpu.PrefetchScalarGridSpec(
            num_scalar_prefetch=0,
            grid=(B // bt, n_tiles),
            in_specs=[
                pl.BlockSpec((bt, C, hw_tile), lambda b, k: (b, 0, k)),
                pl.BlockSpec((C, hid), lambda b, k: (0, 0)),
                pl.BlockSpec((hid, C), lambda b, k: (0, 0)),
            ],
            out_specs=pl.BlockSpec((bt, 1, C), lambda b, k: (b, 0, 0)),
            scratch_shapes=[
                pltpu.VMEM((bt, C), jnp.float32),   # running sum
                pltpu.VMEM((bt, C), jnp.float32),   # running max
            ],
        ),
        compiler_params=pltpu.CompilerParams(
            dimension_semantics=("parallel", "arbitrary"),
            vmem_limit_bytes=vmem_limit),
        cost_estimate=pl.CostEstimate(
            flops=2 * B * C * hw + 8 * B * C * hid,
            transcendentals=B * C,
            bytes_accessed=B * C * hw * itemsize + 2 * hid * C * w_itemsize
            + B * C * itemsize),
    )(x_flat, w1t, w2t)

    return out.reshape(B, C, 1, 1)


def _reference(x, w1, w2):
    # Pure-JAX reference mirroring the PyTorch forward.
    avg = jnp.mean(x, axis=(2, 3))                 # (B, C)
    mx = jnp.max(x, axis=(2, 3))                   # (B, C)

    def mlp(v):
        return jnp.maximum(v @ w1.T, 0.0) @ w2.T

    out = jax.nn.sigmoid(mlp(avg) + mlp(mx))       # (B, C)
    return out[:, :, None, None]


if __name__ == "__main__":
    key = jax.random.PRNGKey(0)
    kx, k1, k2, kx2 = jax.random.split(key, 4)

    B, C, ratio = 2, 32, 16
    hid = C // ratio
    # Deterministic synthetic weights for the 1x1 convs (bias=False).
    w1 = jax.random.normal(k1, (hid, C), dtype=jnp.float32) * 0.1   # f1.weight (out, in)
    w2 = jax.random.normal(k2, (C, hid), dtype=jnp.float32) * 0.1   # f2.weight (out, in)

    # Case 1: H*W fits in a single tile (auto tiling, possible batch folding).
    H, W = 16, 16
    x = jax.random.normal(kx, (B, C, H, W), dtype=jnp.float32)
    out = jax.block_until_ready(channel_attention(x, w1, w2))
    ref = _reference(x, w1, w2)
    assert out.shape == (B, C, 1, 1)
    assert jnp.allclose(out, ref, atol=1e-5, rtol=1e-5)

    # Case 2: H*W (=400) not a multiple of the forced 128-lane tile — exercises
    # the streaming accumulator and the masked partial last tile.
    H2, W2 = 20, 20
    x2 = jax.random.normal(kx2, (B, C, H2, W2), dtype=jnp.float32)
    out2 = jax.block_until_ready(channel_attention(x2, w1, w2, hw_tile=128))
    ref2 = _reference(x2, w1, w2)
    assert out2.shape == (B, C, 1, 1)
    assert jnp.allclose(out2, ref2, atol=1e-5, rtol=1e-5)

    print("KERNEL_OK")
</pallas_src>

<mosaic_0001>
module attributes {stable_mosaic.version = 11 : i64} {
  func.func @_channel_attention_kernel(%arg0: i32, %arg1: i32, %arg2: memref<1x32x256xf32, #tpu.memory_space<vmem>>, %arg3: memref<32x2xf32, #tpu.memory_space<vmem>>, %arg4: memref<2x32xf32, #tpu.memory_space<vmem>>, %arg5: memref<1x1x32xf32, #tpu.memory_space<vmem>>, %arg6: memref<1x32xf32, #tpu.memory_space<vmem>>, %arg7: memref<1x32xf32, #tpu.memory_space<vmem>>) attributes {dimension_semantics = [#tpu.dimension_semantics<parallel>, #tpu.dimension_semantics<arbitrary>], iteration_bounds = array<i64: 2, 1>, scalar_prefetch = 0 : i64, scratch_operands = 2 : i64, tpu.core_type = #tpu.core_type<tc>, window_params = [{transform_indices = @transform_0, window_bounds = array<i64: 1, 32, 256>}, {pipeline_mode = #tpu.pipeline_mode<synchronous>, transform_indices = @transform_1, window_bounds = array<i64: 32, 2>}, {pipeline_mode = #tpu.pipeline_mode<synchronous>, transform_indices = @transform_2, window_bounds = array<i64: 2, 32>}, {transform_indices = @transform_3, window_bounds = array<i64: 1, 1, 32>}]} {
    %c0_i32 = arith.constant 0 : i32
    %0 = arith.cmpi eq, %arg1, %c0_i32 : i32
    %1 = arith.extui %0 : i1 to i32
    %c0_i32_0 = arith.constant 0 : i32
    %2 = arith.cmpi ne, %1, %c0_i32_0 : i32
    scf.if %2 {
      %cst_14 = arith.constant 0.000000e+00 : f32
      %15 = vector.broadcast %cst_14 : f32 to vector<1x32xf32>
      %c0_15 = arith.constant 0 : index
      %c0_16 = arith.constant 0 : index
      %16 = vector.load %arg6[%c0_15, %c0_16] : memref<1x32xf32, #tpu.memory_space<vmem>>, vector<1x32xf32>
      tpu.vector_store %arg6[%c0_15, %c0_16], %15 {strides = array<i32>} : memref<1x32xf32, #tpu.memory_space<vmem>>, vector<1x32xf32>,
      %cst_17 = arith.constant 0xFF800000 : f32
      %17 = vector.broadcast %cst_17 : f32 to vector<1x32xf32>
      %c0_18 = arith.constant 0 : index
      %c0_19 = arith.constant 0 : index
      %18 = vector.load %arg7[%c0_18, %c0_19] : memref<1x32xf32, #tpu.memory_space<vmem>>, vector<1x32xf32>
      tpu.vector_store %arg7[%c0_18, %c0_19], %17 {strides = array<i32>} : memref<1x32xf32, #tpu.memory_space<vmem>>, vector<1x32xf32>,
    } else {
    }
    %c0 = arith.constant 0 : index
    %c0_1 = arith.constant 0 : index
    %c0_2 = arith.constant 0 : index
    %3 = vector.load %arg2[%c0, %c0_1, %c0_2] : memref<1x32x256xf32, #tpu.memory_space<vmem>>, vector<1x32x256xf32>
    %c0_3 = arith.constant 0 : index
    %c0_4 = arith.constant 0 : index
    %4 = vector.load %arg6[%c0_3, %c0_4] : memref<1x32xf32, #tpu.memory_space<vmem>>, vector<1x32xf32>
    %cst = arith.constant dense<0.000000e+00> : vector<1x32xf32>
    %5 = vector.multi_reduction <add>, %3, %cst [2] : vector<1x32x256xf32> to vector<1x32xf32>
    %6 = arith.addf %4, %5 : vector<1x32xf32>
    %c0_5 = arith.constant 0 : index
    %c0_6 = arith.constant 0 : index
    %7 = vector.load %arg6[%c0_5, %c0_6] : memref<1x32xf32, #tpu.memory_space<vmem>>, vector<1x32xf32>
    tpu.vector_store %arg6[%c0_5, %c0_6], %6 {strides = array<i32>} : memref<1x32xf32, #tpu.memory_space<vmem>>, vector<1x32xf32>,
    %c0_7 = arith.constant 0 : index
    %c0_8 = arith.constant 0 : index
    %8 = vector.load %arg7[%c0_7, %c0_8] : memref<1x32xf32, #tpu.memory_space<vmem>>, vector<1x32xf32>
    %cst_9 = arith.constant dense<0xFF800000> : vector<1x32xf32>
    %9 = vector.multi_reduction <maximumf>, %3, %cst_9 [2] : vector<1x32x256xf32> to vector<1x32xf32>
    %10 = arith.maximumf %8, %9 : vector<1x32xf32>
    %c0_10 = arith.constant 0 : index
    %c0_11 = arith.constant 0 : index
    %11 = vector.load %arg7[%c0_10, %c0_11] : memref<1x32xf32, #tpu.memory_space<vmem>>, vector<1x32xf32>
    tpu.vector_store %arg7[%c0_10, %c0_11], %10 {strides = array<i32>} : memref<1x32xf32, #tpu.memory_space<vmem>>, vector<1x32xf32>,
    %c0_i32_12 = arith.constant 0 : i32
    %12 = arith.cmpi eq, %arg1, %c0_i32_12 : i32
    %13 = arith.extui %12 : i1 to i32
    %c0_i32_13 = arith.constant 0 : i32
    %14 = arith.cmpi ne, %13, %c0_i32_13 : i32
    scf.if %14 {
      %c0_14 = arith.constant 0 : index
      %c0_15 = arith.constant 0 : index
      %15 = vector.load %arg3[%c0_14, %c0_15] : memref<32x2xf32, #tpu.memory_space<vmem>>, vector<32x2xf32>
      %c0_16 = arith.constant 0 : index
      %c0_17 = arith.constant 0 : index
      %16 = vector.load %arg4[%c0_16, %c0_17] : memref<2x32xf32, #tpu.memory_space<vmem>>, vector<2x32xf32>
      %c0_18 = arith.constant 0 : index
      %c0_19 = arith.constant 0 : index
      %17 = vector.load %arg6[%c0_18, %c0_19] : memref<1x32xf32, #tpu.memory_space<vmem>>, vector<1x32xf32>
      %cst_20 = arith.constant 3.906250e-03 : f32
      %18 = vector.broadcast %cst_20 : f32 to vector<1x32xf32>
      %19 = arith.mulf %17, %18 : vector<1x32xf32>
      %c0_21 = arith.constant 0 : index
      %c0_22 = arith.constant 0 : index
      %20 = vector.load %arg7[%c0_21, %c0_22] : memref<1x32xf32, #tpu.memory_space<vmem>>, vector<1x32xf32>
      %cst_23 = arith.constant dense<0.000000e+00> : vector<1x2xf32>
      %21 = tpu.matmul %19, %15, %cst_23 {dimension_numbers = #tpu.dot_dimension_numbers<[1], [0], [0], [1], [0, 0, 1, 1], [], []>} : vector<1x32xf32>, vector<32x2xf32>, vector<1x2xf32> -> vector<1x2xf32>
      %cst_24 = arith.constant 0.000000e+00 : f32
      %22 = vector.broadcast %cst_24 : f32 to vector<1x2xf32>
      %23 = arith.maximumf %21, %22 : vector<1x2xf32>
      %cst_25 = arith.constant dense<0.000000e+00> : vector<1x2xf32>
      %24 = tpu.matmul %20, %15, %cst_25 {dimension_numbers = #tpu.dot_dimension_numbers<[1], [0], [0], [1], [0, 0, 1, 1], [], []>} : vector<1x32xf32>, vector<32x2xf32>, vector<1x2xf32> -> vector<1x2xf32>
      %cst_26 = arith.constant 0.000000e+00 : f32
      %25 = vector.broadcast %cst_26 : f32 to vector<1x2xf32>
      %26 = arith.maximumf %24, %25 : vector<1x2xf32>
      %27 = arith.addf %23, %26 : vector<1x2xf32>
      %cst_27 = arith.constant dense<0.000000e+00> : vector<1x32xf32>
      %28 = tpu.matmul %27, %16, %cst_27 {dimension_numbers = #tpu.dot_dimension_numbers<[1], [0], [0], [1], [0, 0, 1, 1], [], []>} : vector<1x2xf32>, vector<2x32xf32>, vector<1x32xf32> -> vector<1x32xf32>
      %29 = arith.negf %28 : vector<1x32xf32>
      %30 = math.exp %29 : vector<1x32xf32>
      %cst_28 = arith.constant 1.000000e+00 : f32
      %31 = vector.broadcast %cst_28 : f32 to vector<1x32xf32>
      %32 = arith.addf %31, %30 : vector<1x32xf32>
      %33 = arith.divf %31, %32 : vector<1x32xf32>
      %34 = vector.shape_cast %33 : vector<1x32xf32> to vector<1x1x32xf32>
      %c0_29 = arith.constant 0 : index
      %c0_30 = arith.constant 0 : index
      %c0_31 = arith.constant 0 : index
      %35 = vector.load %arg5[%c0_29, %c0_30, %c0_31] : memref<1x1x32xf32, #tpu.memory_space<vmem>>, vector<1x1x32xf32>
      tpu.vector_store %arg5[%c0_29, %c0_30, %c0_31], %34 {strides = array<i32>} : memref<1x1x32xf32, #tpu.memory_space<vmem>>, vector<1x1x32xf32>,
    } else {
    }
    return
  }
  func.func @transform_0(%arg0: i32, %arg1: i32) -> (i32, i32, i32) {
    %c0_i32 = arith.constant 0 : i32
    %c0_i32_0 = arith.constant 0 : i32
    return %arg0, %c0_i32, %arg1 : i32, i32, i32
  }
  func.func @transform_1(%arg0: i32, %arg1: i32) -> (i32, i32) {
    %c0_i32 = arith.constant 0 : i32
    %c0_i32_0 = arith.constant 0 : i32
    %c0_i32_1 = arith.constant 0 : i32
    return %c0_i32, %c0_i32_0 : i32, i32
  }
  func.func @transform_2(%arg0: i32, %arg1: i32) -> (i32, i32) {
    %c0_i32 = arith.constant 0 : i32
    %c0_i32_0 = arith.constant 0 : i32
    %c0_i32_1 = arith.constant 0 : i32
    return %c0_i32, %c0_i32_0 : i32, i32
  }
  func.func @transform_3(%arg0: i32, %arg1: i32) -> (i32, i32, i32) {
    %c0_i32 = arith.constant 0 : i32
    %c0_i32_0 = arith.constant 0 : i32
    %c0_i32_1 = arith.constant 0 : i32
    return %arg0, %c0_i32, %c0_i32_0 : i32, i32, i32
  }
}

</mosaic_0001>

<bundles_post_ra>
// kernel: tpu_custom_call.1
= control target key start
LH: loop header
LB: loop body
LE: loop exit
PB: predicated region body
PF: predicated region fallthrough
CT: control target
= control target key end

     0   :  { %8 = vsyncpa [#allocation5], 0  ;;  %s1988_s0 = inlined_call_operand.hbm [shape: f32[2,32,256], index: 0, kind: input, shape index: {}]   ;;  %s1989_s1 = inlined_call_operand.vmem [shape: f32[32,2], index: 1, kind: input, shape index: {}]   ;;  %s1990_s2 = inlined_call_operand.vmem [shape: f32[2,32], index: 2, kind: input, shape index: {}]   ;;  %s1991_s3 = inlined_call_operand.hbm [shape: f32[2,1,32], index: 3, kind: output, shape index: {}]  }
   0x1   :  { %10 = vsyncpa [#allocation5 + $0x1], 0 }
   0x2   :  { %11 = vsyncpa [#allocation6], 0 }
   0x3   :  { %13 = vsyncpa [#allocation6 + $0x1], 0  ;;  %s1632_s12 = smov 0   ;;  %s1634_s13 = smov 0  }
   0x4   :  { %s1636_s14 = smov 0   ;;  %s1638_s15 = smov 0  }
   0x5   :  { %s1640_s16 = smov 0   ;;  %s1642_s17 = smov 0  }
   0x6 LB: > { %s1343_s18 = sadd.s32 4294967295, %s1600_s17   ;;  %s1344_s19 = sadd.s32 4294967294, %s1600_s17   ;;  %s1600_s17 = sphi %s1642_s17, %s19_s17   ;;  %s1596_s16 = sphi %s1640_s16, %s2006_s16   ;;  %s1592_s15 = sphi %s1638_s15, %s2005_s15   ;;  %s1588_s14 = sphi %s1636_s14, %s2004_s14   ;;  %s1584_s13 = sphi %s1634_s13, %s2003_s13   ;;  %s1580_s12 = sphi %s1632_s12, %s2002_s12  }
   0x7   : > { %s31_s20 = sadd.s32 1, %s1596_s16  ;;  %s40_s21 = sadd.s32 1, %s1588_s14 }
   0x8   : > { %p33_p0 = scmp.ge.s32.totalorder %s31_s20, 2  ;;  %p47_p1 = scmp.ne.s32.totalorder %s1588_s14, %s1584_s13 }
   0x9   : > { %p48_p2 = scmp.eq.s32.totalorder %s1600_s17, 0  ;;  %p53_p3 = scmp.ne.s32.totalorder %s1584_s13, %s1580_s12 }
   0xa   : > { %s2008_s20 = smov (%p33_p0, %s31_s20), 0  ;;  %p54_p5 = scmp.eq.s32.totalorder %s1343_s18, 0 }
   0xb   : > { %p1673_p4 = por %p48_p2, %p47_p1  ;;  %s35_s23 = ssub.s32 %s1596_s16, %s2008_s20 }
   0xc   : > { %p119_p6 = scmp.eq.s32.totalorder %s1343_s18, 1  ;;  %p38_p7 = scmp.eq.s32.totalorder %s35_s23, 0 }
   0xd   : > { %p1679_p8 = por %p54_p5, %p53_p3  ;;  %p125_p10 = scmp.eq.s32.totalorder %s1344_s19, 1 }
   0xe   : > { %p1683_p9 = por %p119_p6, %p47_p1  ;;  %p1424_p13 = scmp.lt.s32.totalorder %s1600_s17, 2 }
   0xf   : > { %s1688_s26 = scalar_select %p38_p7, %s1588_s14, %s40_s21  }
  0x10   : > { %s1995_s25 = scalar_select %p1683_p9, 1, 0 }
  0x11   : > { %p1690_p11 = por %p125_p10, %p53_p3  ;;  %s151_s28 = sand.u32 1, %s1588_s14  }
  0x12   : > { %s1347_s29 = sshll.u32 %s151_s28, 6  ;;  %s1360_s30 = sshll.u32 %s1596_s16, 10 }
  0x13   : > { %s1996_s27 = scalar_select %p1690_p11, 1, 0 }
  0x14   : > { %s1701_s6 = scalar_lea.hbm %s1988_s0, %s1360_s30  ;;  %s155_s7 = scalar_lea.vmem [#allocation4], %s1347_s29 }
  0x15   : > { %s164_s8 = sshll.u32 %s155_s7, 4  ;;  %p1707_p0 = pnand %p1424_p13, %p1673_p4  ;;  %s1703_s8 = int_to_ptr.vmem [resolvable:$true] %s164_s8 }
  0x16   : > { %s1712_s10 = scalar_lea.sflag [#allocation5], %s151_s28  ;;  %s1488_s11 = scalar_lea.hbm %s1701_s6, 1024 }
  0x17   : > { %p1489_p2 = scmp.ne.s32.totalorder %s1701_s6, %s1488_s11  ;;  %p1490_p3 = pneg %p1707_p0 }
  0x18   : > { %s1493_s21 = scalar_lea.hbm %s1988_s0, 2048  ;;  %p1494_p4 = scmp.lt.u32.totalorder %s1701_s6, %s1988_s0 }
  0x19   : > { %p1491_p5 = pnand %p1490_p3, %p1489_p2  ;;  %p1495_p7 = scmp.lt.u32.totalorder %s1493_s21, %s1488_s11 }
  0x1a   : > { %p1497_p13 = scmp.lt.u32.totalorder %s1488_s11, %s1701_s6 }
  0x1b   : > { %p1492_p6 = pneg %p1491_p5  ;;  %p1496_p10 = por %p1495_p7, %p1494_p4 }
  0x1d   : > { %p1498_p12 = por %p1497_p13, %p1496_p10 }
  0x1f   : > { %p1499_p1 = pnand %p1498_p12, %p1492_p6 }
  0x21   : > { %1502 = shalt.err (!%p1499_p1)
}
  0x22   : > { %s1503_s28 = scalar_lea.vmem %s1703_s8, 1024  ;;  %s1602_s29 = smov [#allocation4]  }
  0x23   : > { %p1504_p2 = scmp.ne.s32.totalorder %s1703_s8, %s1503_s28  ;;  %s1508_s30 = sshll.u32 %s1602_s29, 4  ;;  %s1509_s30 = int_to_ptr.vmem [resolvable:$false] %s1508_s30 }
  0x24   : > { %s1510_s4 = scalar_lea.vmem %s1509_s30, 2048  ;;  %p1511_p9 = scmp.lt.s32.totalorder %s1703_s8, %s1509_s30 }
  0x25   : > { %p1506_p5 = pnand %p1504_p2, %p1490_p3  ;;  %p1512_p4 = scmp.lt.s32.totalorder %s1510_s4, %s1503_s28 }
  0x27   : > { %p1507_p11 = pneg %p1506_p5  ;;  %p1513_p7 = por %p1512_p4, %p1511_p9 }
  0x29   : > { %p1514_p10 = pnand %p1513_p7, %p1507_p11 }
  0x2b   : > { %1517 = shalt.err (!%p1514_p10)
}
  0x2c   : > { %s1603_s5 = smov 256   ;;  %s1604_s7 = smov 16  }
  0x2d   : > { %1419 = dma.hbm_to_vmem [thread:$0]  (!%p1707_p0), %s1701_s6, 1024, %s1703_s8, %s1712_s10, %s1603_s5, %s1603_s5, %s1604_s7  }
  0x2e   : > { %p172_p12 = scmp.lt.s32.totalorder %s1600_s17, 3  ;;  %p1998_p1 = scmp.ge.s32.totalorder %s1600_s17, 1 }
  0x30   : > { %p173_p3 = pnand %p1998_p1, %p172_p12 }
  0x31   : > { %s1744_s11 = sand.u32 (!%p173_p3), 1, %s1584_s13  }
  0x32   : > { %176 = sbr.rel (%p173_p3) target bundleno = 865 (0x361), region = 32  ;;  %s1351_s18 = sshll.u32 (!%p173_p3), %s1744_s11, 6 }
  0x33   : > { %s179_s19 = scalar_lea.sflag (!%p173_p3), [#allocation5], %s1744_s11  ;;  %s182_s21 = scalar_lea.vmem (!%p173_p3), [#allocation4], %s1351_s18 }
  0x39   : > { %1571 = dma.done.wait (%p1679_p8), %s179_s19, 1024  }
  0x3a   : > { %1573 = vsyncadd (%p1679_p8), %s179_s19, 4294966272  ;;  %v212_v0 = vld [vmem:[%s182_s21] sm:$0xff]  ;;  %v213_v1 = vld [vmem:[%s182_s21 + $0x8] sm:$0xff]  ;;  %v1605_v16 = vmov 0   ;;  %v237_v17 = vlaneseq  ;;  %v1606_v18 = vmov 1966171168  }
  0x3b   : > { %v214_v2 = vld [vmem:[%s182_s21 + $0x10] sm:$0xff]  ;;  %v221_v3 = vadd.f32 %v213_v1, %v212_v0  ;;  %v215_v4 = vld [vmem:[%s182_s21 + $0x18] sm:$0xff]  ;;  %v216_v5 = vld [vmem:[%s182_s21 + $0x20] sm:$0xff]  ;;  %v619_v12 = vmax.f32 %v212_v0, %v213_v1  ;;  %1482 = vset.pattern.permute.xlu0 %v1605_v16  ;;  %1483 = vset.pattern.permute.xlu1 %v1605_v16  ;;  %v370_v19 = vunpack.c.l.s4 %v1606_v18  ;;  %vm209_vm0 = vcmask 253952   ;;  %s1357_s4 = sshll.u32 %s1592_s15, 4  ;;  %s203_s5 = scalar_lea.vmem [#allocation7], %s1744_s11 }
  0x3c   : > { %v217_v6 = vld [vmem:[%s182_s21 + $0x28] sm:$0xff]  ;;  %v218_v8 = vld [vmem:[%s182_s21 + $0x30] sm:$0xff]  ;;  %v219_v9 = vld [vmem:[%s182_s21 + $0x38] sm:$0xff]  ;;  %v224_v10 = vadd.f32 %v215_v4, %v214_v2  ;;  %v622_v13 = vmax.f32 %v214_v2, %v215_v4  ;;  %v1753_v20 = vshrl.u32 %v237_v17, 7  ;;  %vm1610_vm1 = vmmov 0   ;;  %s1266_s7 = sshll.u32 %s203_s5, 4  ;;  %s1938_s21 = scalar_lea.hbm %s1991_s3, %s1357_s4  ;;  %s1940_s7 = int_to_ptr.vmem [resolvable:$true] %s1266_s7 }
  0x3d   : > { %v227_v7 = vadd.f32 %v217_v6, %v216_v5  ;;  %222 = vadd.xlane.f32.xlu0 %v221_v3  ;;  %v230_v11 = vadd.f32 %v219_v9, %v218_v8  ;;  %v625_v14 = vmax.f32 %v216_v5, %v217_v6  ;;  %v628_v15 = vmax.f32 %v218_v8, %v219_v9  ;;  %s1254_s24 = scalar_lea.sflag [#allocation6], %s1744_s11  ;;  %s1518_s6 = scalar_lea.vmem %s1940_s7, 16 }
  0x3e   : > { %v371_v21 = vunpack.c.0.s8 %v370_v19  ;;  %v1756_v22 = vsub.s32 0, %v1753_v20  ;;  %v1759_v23 = vsub.s32 1, %v1753_v20  ;;  %v1762_v24 = vsub.s32 2, %v1753_v20  ;;  %p1519_p8 = scmp.ne.s32.totalorder %s1940_s7, %s1518_s6  ;;  %p1999_p9 = scmp.ne.s32.totalorder %s1995_s25, 0 }
  0x3f   : > { %228 = vadd.xlane.f32.xlu1 %v227_v7  ;;  %v1765_v25 = vsub.s32 3, %v1753_v20  ;;  %v1768_v26 = vsub.s32 4, %v1753_v20  ;;  %v1771_v27 = vsub.s32 5, %v1753_v20  ;;  %v1774_v28 = vsub.s32 6, %v1753_v20  ;;  %s1611_s15 = smov [#allocation7]  }
  0x40   : > { %v1777_v29 = vsub.s32 7, %v1753_v20  ;;  %v1780_v31 = vsub.s32 %v371_v21, %v1753_v20  ;;  %vm584_vm2 = vcmask 130112   ;;  %vm591_vm3 = vcmask 195712   ;;  %p1520_p11 = pnand %p1519_p8, %p1999_p9  ;;  %s1522_s8 = sshll.u32 %s1611_s15, 4  ;;  %s1523_s8 = int_to_ptr.vmem [resolvable:$false] %s1522_s8 }
  0x41   : > { %225 = vadd.xlane.f32.xlu0 %v224_v10  ;;  %vm598_vm4 = vcmask 261312   ;;  %vm1018_vm5 = vcmask 261120   ;;  %vm1172_vm6 = vcmask 1041408   ;;  %vm1168_vm7 = vcmask 15360   ;;  %s1524_s9 = scalar_lea.vmem %s1523_s8, 32  ;;  %p1525_p6 = scmp.lt.s32.totalorder %s1940_s7, %s1523_s8 }
  0x42   : > { %p1521_p0 = pneg %p1520_p11  ;;  %p1526_p13 = scmp.lt.s32.totalorder %s1524_s9, %s1518_s6 }
  0x43   : > { %231 = vadd.xlane.f32.xlu1 %v230_v11 }
  0x44   : > { %p1527_p2 = por %p1526_p13, %p1525_p6 }
  0x45   : > { %620 = vmax.xlane.f32.xlu0 %v619_v12 }
  0x46   : > { %p1528_p5 = pnand %p1527_p2, %p1521_p0 }
  0x47   : > { %623 = vmax.xlane.f32.xlu1 %v622_v13 }
  0x49   : > { %626 = vmax.xlane.f32.xlu0 %v625_v14 }
  0x4b   : > { %629 = vmax.xlane.f32.xlu1 %v628_v15 }
  0xca   : > { %v223_v30 = vpop.xlane.xlu0 %222 }
  0xcb   : > { %v240_v33 = vrot.slane %v223_v30, %v1756_v22  ;;  %v244_v34 = vrot.slane %v223_v30, %v1759_v23  ;;  %v248_v35 = vrot.slane %v223_v30, %v1762_v24  ;;  %v252_v36 = vrot.slane %v223_v30, %v1765_v25 }
  0xcc   : > { %v229_v32 = vpop.xlane.xlu1 %228  ;;  %v256_v37 = vrot.slane %v223_v30, %v1768_v26  ;;  %v260_v38 = vrot.slane %v223_v30, %v1771_v27  ;;  %v264_v39 = vrot.slane %v223_v30, %v1774_v28  ;;  %v268_v40 = vrot.slane %v223_v30, %v1777_v29 }
  0xcd   : > { %v365_v41 = vcombine.low %v240_v33, %v244_v34  ;;  %v366_v42 = vcombine.low %v248_v35, %v252_v36  ;;  %v304_v43 = vrot.slane %v229_v32, %v1756_v22  ;;  %v308_v44 = vrot.slane %v229_v32, %v1759_v23 }
  0xce   : > { %v226_v45 = vpop.xlane.xlu0 %225  ;;  %v367_v46 = vcombine.low %v256_v37, %v260_v38  ;;  %v368_v47 = vcombine.low %v264_v39, %v268_v40  ;;  %v312_v48 = vrot.slane %v229_v32, %v1762_v24  ;;  %v316_v49 = vrot.slane %v229_v32, %v1765_v25 }
  0xcf   : > { %v375_v50 = vrot.slane %v365_v41, %v1780_v31  ;;  %v382_v51 = vrot.slane %v366_v42, %v1780_v31  ;;  %v272_v52 = vrot.slane %v226_v45, %v1756_v22  ;;  %v276_v53 = vrot.slane %v226_v45, %v1759_v23 }
  0xd0   : > { %v389_v54 = vrot.slane %v367_v46, %v1780_v31  ;;  %v396_v55 = vrot.slane %v368_v47, %v1780_v31  ;;  %v280_v56 = vrot.slane %v226_v45, %v1762_v24  ;;  %v284_v57 = vrot.slane %v226_v45, %v1765_v25  ;;  %v232_v6 = vpop.xlane.xlu1 %231 }
  0xd1   : > { %v397_v58 = vcombine.low %v375_v50, %v382_v51  ;;  %v288_v59 = vrot.slane %v226_v45, %v1768_v26  ;;  %v292_v60 = vrot.slane %v226_v45, %v1771_v27  ;;  %v296_v61 = vrot.slane %v226_v45, %v1774_v28 }
  0xd2   : > { %v398_v62 = vcombine.low %v389_v54, %v396_v55  ;;  %v300_v63 = vrot.slane %v226_v45, %v1777_v29  ;;  %v414_v0 = vcombine.low %v272_v52, %v276_v53  ;;  %v415_v1 = vcombine.low %v280_v56, %v284_v57  ;;  %v621_v42 = vpop.xlane.xlu0 %620 }
  0xd3   : > { %v405_v2 = vrot.slane %v397_v58, %v1780_v31  ;;  %v416_v3 = vcombine.low %v288_v59, %v292_v60  ;;  %v320_v4 = vrot.slane %v229_v32, %v1768_v26  ;;  %v324_v5 = vrot.slane %v229_v32, %v1771_v27 }
  0xd4   : > { %v412_v7 = vrot.slane %v398_v62, %v1780_v31  ;;  %v417_v8 = vcombine.low %v296_v61, %v300_v63  ;;  %v424_v9 = vrot.slane %v414_v0, %v1780_v31  ;;  %v431_v10 = vrot.slane %v415_v1, %v1780_v31  ;;  %v624_v59 = vpop.xlane.xlu1 %623 }
  0xd5   : > { %v438_v11 = vrot.slane %v416_v3, %v1780_v31  ;;  %v328_v12 = vrot.slane %v229_v32, %v1774_v28  ;;  %v332_v13 = vrot.slane %v229_v32, %v1777_v29  ;;  %v463_v14 = vcombine.low %v304_v43, %v308_v44 }
  0xd6   : > { %v413_v15 = vcombine.low %v405_v2, %v412_v7  ;;  %v445_v16 = vrot.slane %v417_v8, %v1780_v31  ;;  %v446_v18 = vcombine.low %v424_v9, %v431_v10  ;;  %v464_v19 = vcombine.low %v312_v48, %v316_v49 }
  0xd7   : > { %v465_v21 = vcombine.low %v320_v4, %v324_v5  ;;  %v466_v30 = vcombine.low %v328_v12, %v332_v13  ;;  %v473_v33 = vrot.slane %v463_v14, %v1780_v31  ;;  %v336_v34 = vrot.slane %v232_v6, %v1756_v22 }
  0xd8   : > { %562 = vperm.xlu0 %1482, %v413_v15   ;;  %v447_v35 = vcombine.low %v438_v11, %v445_v16  ;;  %v454_v36 = vrot.slane %v446_v18, %v1780_v31  ;;  %v480_v37 = vrot.slane %v464_v19, %v1780_v31  ;;  %v340_v32 = vrot.slane %v232_v6, %v1759_v23 }
  0xd9   : > { %v487_v38 = vrot.slane %v465_v21, %v1780_v31  ;;  %v494_v39 = vrot.slane %v466_v30, %v1780_v31  ;;  %v344_v40 = vrot.slane %v232_v6, %v1762_v24  ;;  %v348_v41 = vrot.slane %v232_v6, %v1765_v25  ;;  %v627_v30 = vpop.xlane.xlu0 %626 }
  0xda   : > { %v461_v43 = vrot.slane %v447_v35, %v1780_v31  ;;  %v495_v44 = vcombine.low %v473_v33, %v480_v37  ;;  %v352_v45 = vrot.slane %v232_v6, %v1768_v26  ;;  %v356_v46 = vrot.slane %v232_v6, %v1771_v27 }
  0xdb   : > { %v496_v47 = vcombine.low %v487_v38, %v494_v39  ;;  %v360_v48 = vrot.slane %v232_v6, %v1774_v28  ;;  %v364_v49 = vrot.slane %v232_v6, %v1777_v29  ;;  %v512_v50 = vcombine.low %v336_v34, %v340_v32 }
  0xdc   : > { %v462_v51 = vcombine.low %v454_v36, %v461_v43  ;;  %v503_v52 = vrot.slane %v495_v44, %v1780_v31  ;;  %v513_v53 = vcombine.low %v344_v40, %v348_v41  ;;  %v514_v54 = vcombine.low %v352_v45, %v356_v46 }
  0xdd   : > { %v510_v55 = vrot.slane %v496_v47, %v1780_v31  ;;  %v515_v56 = vcombine.low %v360_v48, %v364_v49  ;;  %v522_v57 = vrot.slane %v512_v50, %v1780_v31  ;;  %v638_v58 = vrot.slane %v621_v42, %v1756_v22 }
  0xde   : > { %565 = vperm.xlu1 %1483, %v462_v51   ;;  %v529_v60 = vrot.slane %v513_v53, %v1780_v31  ;;  %v536_v61 = vrot.slane %v514_v54, %v1780_v31  ;;  %v642_v62 = vrot.slane %v621_v42, %v1759_v23  ;;  %v646_v63 = vrot.slane %v621_v42, %v1762_v24 }
  0xdf   : > { %v511_v0 = vcombine.low %v503_v52, %v510_v55  ;;  %v543_v1 = vrot.slane %v515_v56, %v1780_v31  ;;  %v650_v2 = vrot.slane %v621_v42, %v1765_v25  ;;  %v654_v3 = vrot.slane %v621_v42, %v1768_v26  ;;  %v630_v52 = vpop.xlane.xlu1 %629 }
  0xe0   : > { %v544_v4 = vcombine.low %v522_v57, %v529_v60  ;;  %v658_v5 = vrot.slane %v621_v42, %v1771_v27  ;;  %v662_v6 = vrot.slane %v621_v42, %v1774_v28  ;;  %v666_v7 = vrot.slane %v621_v42, %v1777_v29 }
  0xe1   : > { %v545_v8 = vcombine.low %v536_v61, %v543_v1  ;;  %v763_v9 = vcombine.low %v638_v58, %v642_v62  ;;  %v764_v10 = vcombine.low %v646_v63, %v650_v2  ;;  %v670_v11 = vrot.slane %v624_v59, %v1756_v22 }
  0xe2   : > { %568 = vperm.xlu1 %1483, %v511_v0   ;;  %v552_v12 = vrot.slane %v544_v4, %v1780_v31  ;;  %v765_v13 = vcombine.low %v654_v3, %v658_v5  ;;  %v766_v14 = vcombine.low %v662_v6, %v666_v7  ;;  %v674_v15 = vrot.slane %v624_v59, %v1759_v23 }
  0xe3   : > { %v559_v16 = vrot.slane %v545_v8, %v1780_v31  ;;  %v773_v18 = vrot.slane %v763_v9, %v1780_v31  ;;  %v780_v19 = vrot.slane %v764_v10, %v1780_v31  ;;  %v678_v21 = vrot.slane %v624_v59, %v1762_v24 }
  0xe4   : > { %v787_v33 = vrot.slane %v765_v13, %v1780_v31  ;;  %v794_v34 = vrot.slane %v766_v14, %v1780_v31  ;;  %v682_v35 = vrot.slane %v624_v59, %v1765_v25  ;;  %v686_v36 = vrot.slane %v624_v59, %v1768_v26 }
  0xe5   : > { %v560_v37 = vcombine.low %v552_v12, %v559_v16  ;;  %v795_v32 = vcombine.low %v773_v18, %v780_v19  ;;  %v690_v38 = vrot.slane %v624_v59, %v1771_v27  ;;  %v694_v39 = vrot.slane %v624_v59, %v1774_v28 }
  0xe6   : > { %v796_v40 = vcombine.low %v787_v33, %v794_v34  ;;  %v698_v41 = vrot.slane %v624_v59, %v1777_v29  ;;  %v812_v42 = vcombine.low %v670_v11, %v674_v15  ;;  %v813_v43 = vcombine.low %v678_v21, %v682_v35 }
  0xe7   : > { %571 = vperm.xlu1 %1483, %v560_v37   ;;  %v803_v44 = vrot.slane %v795_v32, %v1780_v31  ;;  %v814_v45 = vcombine.low %v686_v36, %v690_v38  ;;  %v702_v46 = vrot.slane %v627_v30, %v1756_v22  ;;  %v706_v47 = vrot.slane %v627_v30, %v1759_v23  ;;  %v1010_v37 = vld [vmem:[%s1989_s1] sm:$0xff]  ;;  %v1011_v32 = vld [vmem:[%s1989_s1 + $0x8] sm:$0xff] }
  0xe8   : > { %v810_v48 = vrot.slane %v796_v40, %v1780_v31  ;;  %v815_v49 = vcombine.low %v694_v39, %v698_v41  ;;  %v822_v50 = vrot.slane %v812_v42, %v1780_v31  ;;  %v829_v51 = vrot.slane %v813_v43, %v1780_v31 }
  0xe9   : > { %v836_v53 = vrot.slane %v814_v45, %v1780_v31  ;;  %v710_v54 = vrot.slane %v627_v30, %v1762_v24  ;;  %v714_v55 = vrot.slane %v627_v30, %v1765_v25  ;;  %v718_v56 = vrot.slane %v627_v30, %v1768_v26  ;;  %v1013_v45 = vld [vmem:[%s1989_s1 + $0x18] sm:$0xff] }
  0xea   : > { %v811_v57 = vcombine.low %v803_v44, %v810_v48  ;;  %v843_v58 = vrot.slane %v815_v49, %v1780_v31  ;;  %v844_v59 = vcombine.low %v822_v50, %v829_v51  ;;  %v722_v60 = vrot.slane %v627_v30, %v1771_v27  ;;  %v1012_v44 = vld [vmem:[%s1989_s1 + $0x10] sm:$0xff] }
  0xeb   : > { %v726_v61 = vrot.slane %v627_v30, %v1774_v28  ;;  %v730_v62 = vrot.slane %v627_v30, %v1777_v29  ;;  %v861_v63 = vcombine.low %v702_v46, %v706_v47  ;;  %v862_v0 = vcombine.low %v710_v54, %v714_v55 }
  0xec   : > { %960 = vperm.xlu1 %1483, %v811_v57   ;;  %v845_v1 = vcombine.low %v836_v53, %v843_v58  ;;  %v852_v2 = vrot.slane %v844_v59, %v1780_v31  ;;  %v863_v3 = vcombine.low %v718_v56, %v722_v60  ;;  %v734_v4 = vrot.slane %v630_v52, %v1756_v22 }
  0xed   : > { %v864_v5 = vcombine.low %v726_v61, %v730_v62  ;;  %v871_v6 = vrot.slane %v861_v63, %v1780_v31  ;;  %v878_v7 = vrot.slane %v862_v0, %v1780_v31  ;;  %v738_v8 = vrot.slane %v630_v52, %v1759_v23 }
  0xee   : > { %v859_v9 = vrot.slane %v845_v1, %v1780_v31  ;;  %v885_v10 = vrot.slane %v863_v3, %v1780_v31  ;;  %v742_v11 = vrot.slane %v630_v52, %v1762_v24  ;;  %v746_v12 = vrot.slane %v630_v52, %v1765_v25 }
  0xef   : > { %v892_v13 = vrot.slane %v864_v5, %v1780_v31  ;;  %v893_v14 = vcombine.low %v871_v6, %v878_v7  ;;  %v750_v22 = vrot.slane %v630_v52, %v1768_v26  ;;  %v754_v15 = vrot.slane %v630_v52, %v1771_v27 }
  0xf0   : > { %v860_v16 = vcombine.low %v852_v2, %v859_v9  ;;  %v758_v18 = vrot.slane %v630_v52, %v1774_v28  ;;  %v762_v23 = vrot.slane %v630_v52, %v1777_v29  ;;  %v910_v19 = vcombine.low %v734_v4, %v738_v8 }
  0xf1   : > { %v894_v21 = vcombine.low %v885_v10, %v892_v13  ;;  %v901_v30 = vrot.slane %v893_v14, %v1780_v31  ;;  %v911_v33 = vcombine.low %v742_v11, %v746_v12  ;;  %v912_v24 = vcombine.low %v750_v22, %v754_v15 }
  0xf2   : > { %963 = vperm.xlu1 %1483, %v860_v16   ;;  %v913_v25 = vcombine.low %v758_v18, %v762_v23  ;;  %v920_v34 = vrot.slane %v910_v19, %v1780_v31  ;;  %v1401_v39 = vpack.c.bf16 %v1011_v32, %v1010_v37  ;;  %v1607_v41 = vmov 0.0|0.0  }
  0xf3   : > { %v908_v35 = vrot.slane %v894_v21, %v1780_v31  ;;  %v927_v26 = vrot.slane %v911_v33, %v1780_v31  ;;  %v934_v27 = vrot.slane %v912_v24, %v1780_v31  ;;  %1400 = vmatprep.subr.bf16.mxu0 %v1607_v41  ;;  %v1608_v43 = vmov 0.0   ;;  %1406 = vmatprep.subr.bf16.mxu1 %v1607_v41  ;;  %v1014_v24 = vld [vmem:[%s1990_s2] sm:$0x3] }
  0xf4   : > { %v941_v28 = vrot.slane %v913_v25, %v1780_v31  ;;  %1402 = vmatpush3.bf16.msra.mxu0 %v1401_v39  ;;  %210 = vst.msk [vmem:[#allocation2] sm:$0x1] %vm209_vm0, %v1608_v43  ;;  %1408 = vmatpush3.bf16.msra.mxu1 %v1401_v39  ;;  %v1609_v47 = vmov -inf   ;;  %v1404_v48 = vpack.c.bf16 %v1013_v45, %v1012_v44  ;;  %v574_v49 = vand.u32 127, %v237_v17 }
  0xf5   : > { %v909_v36 = vcombine.low %v901_v30, %v908_v35  ;;  %v942_v29 = vcombine.low %v920_v34, %v927_v26  ;;  %1403 = vmatprep.subr.bf16.mxu0 %v1607_v41  ;;  %211 = vst.msk [vmem:[#allocation3] sm:$0x1] %vm209_vm0, %v1609_v47  ;;  %1409 = vmatprep.subr.bf16.mxu1 %v1607_v41 }
  0xf6   : > { %v943_v38 = vcombine.low %v934_v27, %v941_v28  ;;  %1381 = vmatprep.mubr.msk.f32.mxu0 %vm1610_vm1, %v1608_v43  ;;  %1392 = vmatprep.mubr.msk.f32.mxu1 %vm1610_vm1, %v1608_v43  ;;  %v579_v50 = vadd.s32 4294967288, %v574_v49  ;;  %v586_v51 = vadd.s32 4294967280, %v574_v49  ;;  %v593_v54 = vadd.s32 4294967272, %v574_v49 }
  0xf7   : > { %966 = vperm.xlu1 %1483, %v909_v36   ;;  %v950_v40 = vrot.slane %v942_v29, %v1780_v31  ;;  %v577_v56 = vsub.s32 %v574_v49, %v1753_v20 }
  0xf8   : > { %v957_v42 = vrot.slane %v943_v38, %v1780_v31  ;;  %1405 = vmatpush3.bf16.msra.mxu0 %v1404_v48  ;;  %1411 = vmatpush3.bf16.msra.mxu1 %v1404_v48  ;;  %v582_v53 = vsub.s32 %v579_v50, %v1753_v20  ;;  %v589_v55 = vsub.s32 %v586_v51, %v1753_v20 }
  0xf9   : > { %1395 = vmatprep.subr.mxu0 %v1608_v43  ;;  %v596_v60 = vsub.s32 %v593_v54, %v1753_v20 }
  0xfa   : > { %v958_v46 = vcombine.low %v950_v40, %v957_v42 }
  0xfb   : > { %v220_v5 = vld [vmem:[#allocation2] sm:$0x1] }
  0xfc   : > { %969 = vperm.xlu1 %1483, %v958_v46   ;;  %v618_v19 = vld [vmem:[#allocation3] sm:$0x1] }
 0x157   : > { %v563_v58 = vpop.permute.xlu0 %562 }
 0x158   : > { %v578_v62 = vrot.slane %v563_v58, %v577_v56 }
 0x15d   : > { %v566_v52 = vpop.permute.xlu1 %565 }
 0x15e   : > { %v583_v59 = vrot.slane %v566_v52, %v582_v53 }
 0x160   : > { %v585_v63 = vsel %vm584_vm2, %v583_v59, %v578_v62 }
 0x161   : > { %v569_v57 = vpop.permute.xlu1 %568 }
 0x162   : > { %v590_v61 = vrot.slane %v569_v57, %v589_v55 }
 0x164   : > { %v592_v1 = vsel %vm591_vm3, %v590_v61, %v585_v63 }
 0x166   : > { %v572_v17 = vpop.permute.xlu1 %571 }
 0x167   : > { %v597_v0 = vrot.slane %v572_v17, %v596_v60 }
 0x169   : > { %v599_v2 = vsel %vm598_vm4, %v597_v0, %v592_v1 }
 0x16a   : > { %v606_v3 = vrot.slane %v599_v2, %v1780_v31 }
 0x16b   : > { %v961_v4 = vpop.permute.xlu1 %960 }
 0x16c   : > { %v613_v6 = vrot.slane %v606_v3, %v1780_v31  ;;  %v974_v13 = vrot.slane %v961_v4, %v577_v56 }
 0x16e   : > { %v615_v20 = vadd.f32 %v613_v6, %v220_v5 }
 0x170   : > { %617 = vst.msk [vmem:[#allocation2] sm:$0x1] %vm209_vm0, %v615_v20 }
 0x171   : > { %v964_v7 = vpop.permute.xlu1 %963 }
 0x172   : > { %v978_v10 = vrot.slane %v964_v7, %v582_v53 }
 0x174   : > { %v979_v22 = vsel %vm584_vm2, %v978_v10, %v974_v13 }
 0x176   : > { %v967_v8 = vpop.permute.xlu1 %966 }
 0x177   : > { %v1015_v9 = vld [vmem:[#allocation2] sm:$0x1]  ;;  %v983_v12 = vrot.slane %v967_v8, %v589_v55 }
 0x178   : > { %v1016_v11 = vmul.f32 0.00390625, %v1015_v9 }
 0x179   : > { %v984_v16 = vsel %vm591_vm3, %v983_v12, %v979_v22 }
 0x17a   : > { %1382 = vmatmul.mubr.msk.f32.vlgmr.msra.gmra.mrb[0].mxu0 %vm1018_vm5, %v1016_v11 }
 0x17b   : > { %v970_v14 = vpop.permute.xlu1 %969  ;;  %1397 = vmatprep.mubr.msk.f32.mxu0 %vm1610_vm1, %v1608_v43  ;;  %1396 = vmatpush3.msk.msra.mxu0 %vm1172_vm6, %v1014_v24 }
 0x17c   : > { %v988_v15 = vrot.slane %v970_v14, %v596_v60 }
 0x17e   : > { %v989_v18 = vsel %vm598_vm4, %v988_v15, %v984_v16 }
 0x17f   : > { %v996_v23 = vrot.slane %v989_v18, %v1780_v31 }
 0x181   : > { %v1003_v21 = vrot.slane %v996_v23, %v1780_v31 }
 0x183   : > { %v1005_v30 = vmax.f32 %v618_v19, %v1003_v21 }
 0x185   : > { %1006 = vst.msk [vmem:[#allocation3] sm:$0x1] %vm209_vm0, %v1005_v30 }
 0x18c   : > { %v1017_v33 = vld [vmem:[#allocation3] sm:$0x1] }
 0x18d   : > { %1393 = vmatmul.mubr.msk.f32.vlgmr.msra.gmra.mrb[0].mxu1 %vm1018_vm5, %v1017_v33 }
 0x24d   : > { %v1088_v25 = vpop.f32.mrb[0].mxu0 }
 0x24e   : > { %v1383_v34 = vpop.f32.mrb[1].mxu0  ;;  %v1092_v26 = vmax.f32 %v1088_v25, 0.0 }
 0x260   : > { %v1162_v35 = vpop.f32.mrb[0].mxu1 }
 0x261   : > { %v1166_v27 = vmax.f32 %v1162_v35, 0.0  ;;  %v1394_v31 = vpop.f32.mrb[1].mxu1 }
 0x263   : > { %v1167_v28 = vadd.f32 %v1166_v27, %v1092_v26 }
 0x265   : > { %1398 = vmatmul.mubr.msk.f32.vlgmr.msra.gmra.mrb[2].mxu0 %vm1168_vm7, %v1167_v28 }
 0x338   : > { %v1242_v36 = vpop.f32.mrb[2].mxu0 }
 0x339   : > { %v1356_v29 = vmul.f32 -1.442695, %v1242_v36  ;;  %v1399_v37 = vpop.f32.mrb[3].mxu0 }
 0x33b   : > { %1484 = vpow2.f32 %v1356_v29 }
 0x345   : > { %v1485_v32 = vpop.eup %1484 }
 0x346   : > { %v1249_v38 = vadd.f32 1.0, %v1485_v32 }
 0x348   : > { %1486 = vrcp.f32 %v1249_v38 }
 0x352   : > { %v1487_v39 = vpop.eup %1486 }
 0x353   : > { %1252 = vst.msk [vmem:[%s203_s5] sm:$0x1] %vm209_vm0, %v1487_v39 }
 0x354   : > { %1531 = shalt.err (!%p1528_p5)
}
 0x355   : > { %s1532_s11 = scalar_lea.hbm %s1938_s21, 16  ;;  %s1536_s23 = scalar_lea.hbm %s1991_s3, 32 }
 0x356   : > { %p1533_p4 = scmp.ne.s32.totalorder %s1938_s21, %s1532_s11  ;;  %p1537_p12 = scmp.lt.u32.totalorder %s1938_s21, %s1991_s3 }
 0x357   : > { %p1538_p1 = scmp.lt.u32.totalorder %s1536_s23, %s1532_s11  ;;  %p1540_p8 = scmp.lt.u32.totalorder %s1532_s11, %s1938_s21 }
 0x358   : > { %p1534_p7 = pnand %p1533_p4, %p1999_p9 }
 0x359   : > { %p1539_p3 = por %p1538_p1, %p1537_p12 }
 0x35a   : > { %p1535_p10 = pneg %p1534_p7 }
 0x35b   : > { %p1541_p11 = por %p1540_p8, %p1539_p3 }
 0x35d   : > { %p1542_p0 = pnand %p1541_p11, %p1535_p10 }
 0x35f   : > { %1545 = shalt.err (!%p1542_p0)
}
 0x360   : > { %1414 = dma.vmem_to_hbm [thread:$0]  (%p1999_p9), %s1940_s7, 16, %s1938_s21, %s1254_s24  }
 0x361 PF: > { %s1278_s30 = sand.u32 1, %s1580_s12   ;;  %p2000_p6 = scmp.ne.s32.totalorder %s1996_s27, 0 }
 0x362   : > { %p2001_p13 = scmp.ge.s32.totalorder %s1600_s17, 2  ;;  %s1279_s4 = scalar_lea.sflag [#allocation6], %s1278_s30 }
 0x364   : > { %p1421_p2 = pnand %p2001_p13, %p2000_p6 }
 0x366   : > { %1575 = dma.done.wait (!%p1421_p2), %s1279_s4, 16  }
 0x367   : > { %1577 = vsyncadd (!%p1421_p2), %s1279_s4, 4294967280  ;;  %s19_s17 = sadd.s32 1, %s1600_s17   ;;  %s2002_s12 = smov %s1584_s13 }
 0x368   : > { %p16_p5 = scmp.ge.s32.totalorder %s19_s17, 4   ;;  %s2003_s13 = smov %s1588_s14 }
 0x369   : > { %s2004_s14 = smov %s1688_s26  ;;  %s2005_s15 = smov %s1596_s16 }
 0x36a   : > { %s2006_s16 = smov %s2008_s20  ;;  %18 = sbr.rel (!%p16_p5) target bundleno = 6 (0x6), region = 85 }
 0x371   :  { %1283 = vsyncpa [#allocation5], 1 }
 0x372   :  { %1285 = vsyncpa [#allocation5 + $0x1], 1 }
 0x373   :  { %1286 = vsyncpa [#allocation6], 1 }
 0x374   :  { %1288 = vsyncpa [#allocation6 + $0x1], 1 }

</bundles_post_ra>
